<compile_context>
chip_gen: v7x
topology: tpu7x:2x2x1
jax: 0.10.0
libtpu: 0.0.40
codegen_flags: <defaults>
</compile_context>

<pallas_src>
import jax
import jax.numpy as jnp
from jax.experimental import pallas as pl
from jax.experimental.pallas import tpu as pltpu


def _round_up(x, m):
    return ((x + m - 1) // m) * m


def _tpu_vmem_bytes():
    """Physical per-core VMEM; conservative v7x fallback if the query fails."""
    try:
        return int(pltpu.get_tpu_info().vmem_capacity_bytes)
    except Exception:
        return 64 * 1024 * 1024


def _acrnet_kernel(x_ref, w1_ref, b1_ref, wh_ref, feat_ref, hpart_ref):
    """Fused ACRNet forward body.

    grid = (n_f, n_k): axis 0 ("parallel", megacore on v7x) tiles the feature
    dim; axis 1 ("arbitrary") streams / reduces over the flattened-input dim.
    `feat` accumulates directly in its VMEM-resident output block; on the last
    K step the bias is added and this core's slice of the fused classifier
    head ([logits | logits_aux]) partial product is emitted.
    """
    k = pl.program_id(1)

    @pl.when(k == 0)
    def _():
        feat_ref[...] = jnp.zeros_like(feat_ref)

    # Backbone feature projection partial sum: [B, tk] @ [tk, tf], bf16 in / f32 acc.
    feat_ref[...] += jnp.dot(x_ref[...], w1_ref[...],
                             preferred_element_type=jnp.float32)

    @pl.when(k == pl.num_programs(1) - 1)
    def _():
        feat = feat_ref[...] + b1_ref[...]             # f32
        feat_ref[...] = feat
        # Fused heads ([main classifier | aux_classifier]); partial over this
        # core's feature slice, summed (plus bias) across f blocks in JAX.
        hpart_ref[...] = jnp.dot(feat.astype(wh_ref.dtype), wh_ref[...],
                                 preferred_element_type=jnp.float32)


def pack_acrnet_params(params, *, max_batch=128, tk=None, head_dtype=jnp.bfloat16):
    """Pre-pack ACRNet weights for the fused kernel.  Call ONCE, not per step.

    Casts matmul weights to bf16, zero-pads lane dims to multiples of 128,
    fuses [wc | wa] into one lane-dense head weight, and derives the
    generation-aware launch configuration (K tile, feature split, VMEM limit).
    """
    w1, b1 = params["w1"], params["b1"]
    wc, bc = params["wc"], params["bc"]
    wa, ba = params["wa"], params["ba"]
    d_in, F = int(w1.shape[0]), int(w1.shape[1])
    C = int(wc.shape[1])

    f_pad = _round_up(F, 128)
    n_pad = _round_up(2 * C, 128)
    b_pad = max(8, _round_up(int(max_batch), 8))

    vmem = _tpu_vmem_bytes()
    # ~75% of physical VMEM: ~96 MiB on v5e/v6e (128 MiB), ~48 MiB on v7x (64 MiB).
    vmem_limit = min((vmem * 3) // 4, 112 * 1024 * 1024)

    # v7x (64 MiB VMEM, 2 TensorCores): split the feature dim across cores so
    # each core streams disjoint w1 columns (no duplicated w1 HBM traffic).
    n_f = 2 if (vmem <= 64 * 1024 * 1024 and f_pad % 256 == 0) else 1
    tf = f_pad // n_f

    if tk is None:
        # Per-core double-buffered VMEM budget (bf16 streams, f32 outputs).
        # The K-invariant blocks (b1, wh) are kept default double-buffered and
        # accounted for here rather than single-buffered.
        budget = vmem_limit - 4 * 1024 * 1024          # Mosaic scratch headroom
        fixed = (2 * tf * n_pad * 2                     # fused head weight
                 + 2 * tf * 4                           # b1
                 + 2 * b_pad * tf * 4                   # feat output block
                 + 2 * b_pad * n_pad * 4)               # head-partial output block
        per_tk = 2 * (b_pad + tf) * 2                   # x + w1 streams
        tk = max(128, (budget - fixed) // per_tk)
    tk = int(min(tk, 2048, _round_up(d_in, 128)))
    tk = max(128, (tk // 128) * 128)                    # lane / bf16-sublane aligned
    d_pad = _round_up(d_in, tk)

    # NOTE: w1 is the roofline-setting HBM stream; lane padding multiplies it
    # by f_pad/F (4x at F=32).  Use num_features % 128 == 0 in real deployments.
    w1_p = jnp.zeros((d_pad, f_pad), jnp.bfloat16).at[:d_in, :F].set(
        w1.astype(jnp.bfloat16))
    b1_p = jnp.zeros((1, f_pad), jnp.float32).at[:, :F].set(
        b1.reshape(1, F).astype(jnp.float32))
    wh = jnp.concatenate([wc, wa], axis=1).astype(head_dtype)
    wh_p = jnp.zeros((f_pad, n_pad), head_dtype).at[:F, :2 * C].set(wh)
    bh = jnp.concatenate([bc, ba], axis=1).reshape(1, 2 * C).astype(jnp.float32)
    bh_p = jnp.zeros((1, n_pad), jnp.float32).at[:, :2 * C].set(bh)

    return {
        "w1": w1_p, "b1": b1_p, "wh": wh_p, "bh": bh_p,
        "d_in": d_in, "F": F, "C": C,
        "d_pad": d_pad, "f_pad": f_pad, "n_pad": n_pad,
        "tk": tk, "tf": tf, "n_f": n_f,
        "vmem_limit": int(vmem_limit),
    }


def acrnet_forward(x_nchw, packed):
    """Fused ACRNet forward.  Returns {'feat','logits','logits_aux'} like PyTorch."""
    B = int(x_nchw.shape[0])
    d_in, F, C = packed["d_in"], packed["F"], packed["C"]
    d_pad, f_pad, n_pad = packed["d_pad"], packed["f_pad"], packed["n_pad"]
    tk, tf, n_f = packed["tk"], packed["tf"], packed["n_f"]
    n_k = d_pad // tk
    b_pad = max(8, _round_up(B, 8))          # f32 sublane-friendly M

    x_flat = x_nchw.reshape(B, -1)
    assert x_flat.shape[1] == d_in, (x_flat.shape, d_in)
    # Per-call activation prep only (weights were packed once at init).
    x_p = jnp.zeros((b_pad, d_pad), jnp.bfloat16).at[:B, :d_in].set(
        x_flat.astype(jnp.bfloat16))

    cost = pl.CostEstimate(
        flops=2 * b_pad * d_pad * f_pad + 2 * b_pad * f_pad * n_pad,
        transcendentals=0,
        bytes_accessed=(n_f * b_pad * d_pad * 2 + d_pad * f_pad * 2
                        + f_pad * n_pad * 2 + f_pad * 4
                        + b_pad * f_pad * 4 + n_f * b_pad * n_pad * 4),
    )

    feat_p, head_parts = pl.pallas_call(
        _acrnet_kernel,
        out_shape=(
            jax.ShapeDtypeStruct((b_pad, f_pad), jnp.float32),
            jax.ShapeDtypeStruct((n_f, b_pad, n_pad), jnp.float32),
        ),
        grid_spec=pltpu.PrefetchScalarGridSpec(
            num_scalar_prefetch=0,
            grid=(n_f, n_k),                                      # (feature split, K)
            in_specs=[
                pl.BlockSpec((b_pad, tk), lambda f, k: (0, k)),   # x (streamed over K)
                pl.BlockSpec((tk, tf), lambda f, k: (k, f)),      # w1 (streamed over K)
                pl.BlockSpec((1, tf), lambda f, k: (0, f)),       # b1 (K-invariant)
                pl.BlockSpec((tf, n_pad), lambda f, k: (f, 0)),   # fused head weight
            ],
            out_specs=(
                pl.BlockSpec((b_pad, tf), lambda f, k: (0, f)),               # feat
                pl.BlockSpec((None, b_pad, n_pad), lambda f, k: (f, 0, 0)),   # head part
            ),
        ),
        compiler_params=pltpu.CompilerParams(
            # f split is independent (megacore sharding); K is the reduction.
            dimension_semantics=("parallel", "arbitrary"),
            vmem_limit_bytes=packed["vmem_limit"],
        ),
        cost_estimate=cost,
    )(x_p, packed["w1"], packed["b1"], packed["wh"])

    # Sum per-f-block head partials and add the fused bias in plain JAX.
    head = head_parts.sum(axis=0) + packed["bh"]                  # (b_pad, n_pad) f32
    return {
        "feat": feat_p[:B, :F],
        "logits": head[:B, :C],
        "logits_aux": head[:B, C:2 * C],
    }


def init_params(key, d_in, num_features, num_classes):
    """Deterministic init mimicking nn.Linear default (U[-1/sqrt(fan_in), ...])."""
    k1, k2, k3, k4, k5, k6 = jax.random.split(key, 6)

    def lin(kw, kb, fan_in, fan_out):
        bound = 1.0 / jnp.sqrt(jnp.float32(fan_in))
        w = jax.random.uniform(kw, (fan_in, fan_out), jnp.float32, -bound, bound)
        b = jax.random.uniform(kb, (1, fan_out), jnp.float32, -bound, bound)
        return w, b

    w1, b1 = lin(k1, k2, d_in, num_features)          # backbone feature proj
    wc, bc = lin(k3, k4, num_features, num_classes)   # backbone classifier
    wa, ba = lin(k5, k6, num_features, num_classes)   # ACR aux_classifier
    return {"w1": w1, "b1": b1, "wc": wc, "bc": bc, "wa": wa, "ba": ba}


if __name__ == "__main__":
    # Small shapes: batch=2, channels=4, spatial=16x16, num_features=32, classes=10.
    # At these toy shapes the kernel is fixed-overhead dominated; the tiling /
    # VMEM-budget logic pays off at production d_in / num_features / batch.
    B, Cin, H, W = 2, 4, 16, 16
    num_features, num_classes = 32, 10
    d_in = Cin * H * W

    key = jax.random.PRNGKey(0)
    kx, kp = jax.random.split(key)
    x = jax.random.normal(kx, (B, Cin, H, W), jnp.float32)   # NCHW like PyTorch
    params = init_params(kp, d_in, num_features, num_classes)

    # Weight packing happens ONCE here (init time), not on every forward call.
    packed = pack_acrnet_params(params, max_batch=B)
    packed = jax.block_until_ready(packed)

    out = acrnet_forward(x, packed)
    jax.block_until_ready(out)

    # Reference with the same bf16 matmul operands (f32 accumulate), matching
    # what the MXU computes, so the comparison is tight.
    x_flat = x.reshape(B, d_in)
    xb = x_flat.astype(jnp.bfloat16).astype(jnp.float32)
    w1b = params["w1"].astype(jnp.bfloat16).astype(jnp.float32)
    feat_ref = xb @ w1b + params["b1"]
    fb = feat_ref.astype(jnp.bfloat16).astype(jnp.float32)
    wcb = params["wc"].astype(jnp.bfloat16).astype(jnp.float32)
    wab = params["wa"].astype(jnp.bfloat16).astype(jnp.float32)
    logits_ref = fb @ wcb + params["bc"]
    aux_ref = fb @ wab + params["ba"]

    assert out["feat"].shape == (B, num_features)
    assert out["logits"].shape == (B, num_classes)
    assert out["logits_aux"].shape == (B, num_classes)
    assert jnp.allclose(out["feat"], feat_ref, atol=5e-3, rtol=5e-3)
    assert jnp.allclose(out["logits"], logits_ref, atol=5e-3, rtol=5e-3)
    assert jnp.allclose(out["logits_aux"], aux_ref, atol=5e-3, rtol=5e-3)

    print("KERNEL_OK")
</pallas_src>

<mosaic_0001>
module attributes {stable_mosaic.version = 11 : i64} {
  func.func @_acrnet_kernel(%arg0: i32, %arg1: i32, %arg2: memref<8x1024xbf16, #tpu.memory_space<vmem>>, %arg3: memref<1024x128xbf16, #tpu.memory_space<vmem>>, %arg4: memref<1x128xf32, #tpu.memory_space<vmem>>, %arg5: memref<128x128xbf16, #tpu.memory_space<vmem>>, %arg6: memref<8x128xf32, #tpu.memory_space<vmem>>, %arg7: memref<1x8x128xf32, #tpu.memory_space<vmem>>) attributes {dimension_semantics = [#tpu.dimension_semantics<parallel>, #tpu.dimension_semantics<arbitrary>], iteration_bounds = array<i64: 1, 1>, scalar_prefetch = 0 : i64, scratch_operands = 0 : i64, tpu.core_type = #tpu.core_type<tc>, window_params = [{transform_indices = @transform_0, window_bounds = array<i64: 8, 1024>}, {transform_indices = @transform_1, window_bounds = array<i64: 1024, 128>}, {transform_indices = @transform_2, window_bounds = array<i64: 1, 128>}, {transform_indices = @transform_3, window_bounds = array<i64: 128, 128>}, {transform_indices = @transform_4, window_bounds = array<i64: 8, 128>}, {transform_indices = @transform_5, window_bounds = array<i64: 1, 8, 128>}]} {
    %c0_i32 = arith.constant 0 : i32
    %0 = arith.cmpi eq, %arg1, %c0_i32 : i32
    %1 = arith.extui %0 : i1 to i32
    %c0_i32_0 = arith.constant 0 : i32
    %2 = arith.cmpi ne, %1, %c0_i32_0 : i32
    scf.if %2 {
      %cst_10 = arith.constant 0.000000e+00 : f32
      %12 = vector.broadcast %cst_10 : f32 to vector<8x128xf32>
      %c0_11 = arith.constant 0 : index
      %c0_12 = arith.constant 0 : index
      %13 = vector.load %arg6[%c0_11, %c0_12] : memref<8x128xf32, #tpu.memory_space<vmem>>, vector<8x128xf32>
      tpu.vector_store %arg6[%c0_11, %c0_12], %12 {strides = array<i32>} : memref<8x128xf32, #tpu.memory_space<vmem>>, vector<8x128xf32>,
    } else {
    }
    %c0 = arith.constant 0 : index
    %c0_1 = arith.constant 0 : index
    %3 = vector.load %arg6[%c0, %c0_1] : memref<8x128xf32, #tpu.memory_space<vmem>>, vector<8x128xf32>
    %c0_2 = arith.constant 0 : index
    %c0_3 = arith.constant 0 : index
    %4 = vector.load %arg2[%c0_2, %c0_3] : memref<8x1024xbf16, #tpu.memory_space<vmem>>, vector<8x1024xbf16>
    %c0_4 = arith.constant 0 : index
    %c0_5 = arith.constant 0 : index
    %5 = vector.load %arg3[%c0_4, %c0_5] : memref<1024x128xbf16, #tpu.memory_space<vmem>>, vector<1024x128xbf16>
    %cst = arith.constant dense<0.000000e+00> : vector<8x128xf32>
    %6 = tpu.matmul %4, %5, %cst {dimension_numbers = #tpu.dot_dimension_numbers<[1], [0], [0], [1], [0, 0, 1, 1], [], []>} : vector<8x1024xbf16>, vector<1024x128xbf16>, vector<8x128xf32> -> vector<8x128xf32>
    %7 = arith.addf %3, %6 : vector<8x128xf32>
    %c0_6 = arith.constant 0 : index
    %c0_7 = arith.constant 0 : index
    %8 = vector.load %arg6[%c0_6, %c0_7] : memref<8x128xf32, #tpu.memory_space<vmem>>, vector<8x128xf32>
    tpu.vector_store %arg6[%c0_6, %c0_7], %7 {strides = array<i32>} : memref<8x128xf32, #tpu.memory_space<vmem>>, vector<8x128xf32>,
    %c0_i32_8 = arith.constant 0 : i32
    %9 = arith.cmpi eq, %arg1, %c0_i32_8 : i32
    %10 = arith.extui %9 : i1 to i32
    %c0_i32_9 = arith.constant 0 : i32
    %11 = arith.cmpi ne, %10, %c0_i32_9 : i32
    scf.if %11 {
      %c0_10 = arith.constant 0 : index
      %c0_11 = arith.constant 0 : index
      %12 = vector.load %arg6[%c0_10, %c0_11] : memref<8x128xf32, #tpu.memory_space<vmem>>, vector<8x128xf32>
      %c0_12 = arith.constant 0 : index
      %c0_13 = arith.constant 0 : index
      %13 = vector.load %arg4[%c0_12, %c0_13] : memref<1x128xf32, #tpu.memory_space<vmem>>, vector<1x128xf32>
      %14 = vector.broadcast %13 : vector<1x128xf32> to vector<8x128xf32>
      %15 = arith.addf %12, %14 : vector<8x128xf32>
      %c0_14 = arith.constant 0 : index
      %c0_15 = arith.constant 0 : index
      %16 = vector.load %arg6[%c0_14, %c0_15] : memref<8x128xf32, #tpu.memory_space<vmem>>, vector<8x128xf32>
      tpu.vector_store %arg6[%c0_14, %c0_15], %15 {strides = array<i32>} : memref<8x128xf32, #tpu.memory_space<vmem>>, vector<8x128xf32>,
      %17 = arith.truncf %15 : vector<8x128xf32> to vector<8x128xbf16>
      %c0_16 = arith.constant 0 : index
      %c0_17 = arith.constant 0 : index
      %18 = vector.load %arg5[%c0_16, %c0_17] : memref<128x128xbf16, #tpu.memory_space<vmem>>, vector<128x128xbf16>
      %cst_18 = arith.constant dense<0.000000e+00> : vector<8x128xf32>
      %19 = tpu.matmul %17, %18, %cst_18 {dimension_numbers = #tpu.dot_dimension_numbers<[1], [0], [0], [1], [0, 0, 1, 1], [], []>} : vector<8x128xbf16>, vector<128x128xbf16>, vector<8x128xf32> -> vector<8x128xf32>
      %c0_19 = arith.constant 0 : index
      %c0_20 = arith.constant 0 : index
      %c0_21 = arith.constant 0 : index
      %20 = vector.load %arg7[%c0_19, %c0_20, %c0_21] : memref<1x8x128xf32, #tpu.memory_space<vmem>>, vector<1x8x128xf32>
      %21 = vector.shape_cast %20 : vector<1x8x128xf32> to vector<8x128xf32>
      %22 = vector.shape_cast %19 : vector<8x128xf32> to vector<1x8x128xf32>
      tpu.vector_store %arg7[%c0_19, %c0_20, %c0_21], %22 {strides = array<i32>} : memref<1x8x128xf32, #tpu.memory_space<vmem>>, vector<1x8x128xf32>,
    } else {
    }
    return
  }
  func.func @transform_0(%arg0: i32, %arg1: i32) -> (i32, i32) {
    %c0_i32 = arith.constant 0 : i32
    %c0_i32_0 = arith.constant 0 : i32
    return %c0_i32, %arg1 : i32, i32
  }
  func.func @transform_1(%arg0: i32, %arg1: i32) -> (i32, i32) {
    %c0_i32 = arith.constant 0 : i32
    return %arg1, %arg0 : i32, i32
  }
  func.func @transform_2(%arg0: i32, %arg1: i32) -> (i32, i32) {
    %c0_i32 = arith.constant 0 : i32
    %c0_i32_0 = arith.constant 0 : i32
    return %c0_i32, %arg0 : i32, i32
  }
  func.func @transform_3(%arg0: i32, %arg1: i32) -> (i32, i32) {
    %c0_i32 = arith.constant 0 : i32
    %c0_i32_0 = arith.constant 0 : i32
    return %arg0, %c0_i32 : i32, i32
  }
  func.func @transform_4(%arg0: i32, %arg1: i32) -> (i32, i32) {
    %c0_i32 = arith.constant 0 : i32
    %c0_i32_0 = arith.constant 0 : i32
    return %c0_i32, %arg0 : i32, i32
  }
  func.func @transform_5(%arg0: i32, %arg1: i32) -> (i32, i32, i32) {
    %c0_i32 = arith.constant 0 : i32
    %c0_i32_0 = arith.constant 0 : i32
    %c0_i32_1 = arith.constant 0 : i32
    return %arg0, %c0_i32, %c0_i32_0 : i32, i32, i32
  }
}

</mosaic_0001>

<bundles_post_ra>
// kernel: tpu_custom_call.1
= control target key start
LH: loop header
LB: loop body
LE: loop exit
PB: predicated region body
PF: predicated region fallthrough
CT: control target
= control target key end

     0   :  { %11 = vsyncpa [#allocation3], 0  ;;  %s1435_s0 = inlined_call_operand.hbm [shape: bf16[8,1024], index: 0, kind: input, shape index: {}]   ;;  %s1436_s1 = inlined_call_operand.hbm [shape: bf16[1024,128], index: 1, kind: input, shape index: {}]   ;;  %s1437_s2 = inlined_call_operand.vmem [shape: f32[1,128], index: 2, kind: input, shape index: {}]   ;;  %s1438_s3 = inlined_call_operand.hbm [shape: bf16[128,128], index: 3, kind: input, shape index: {}]   ;;  %s1439_s4 = inlined_call_operand.hbm [shape: f32[8,128], index: 4, kind: output, shape index: {0}]   ;;  %s1440_s5 = inlined_call_operand.hbm [shape: f32[1,8,128], index: 5, kind: output, shape index: {1}]  }
   0x1   :  { %12 = vsyncpa [#allocation6], 0 }
   0x2   :  { %13 = vsyncpa [#allocation4], 0 }
   0x3   :  { %14 = vsyncpa [#allocation10], 0  ;;  %s1327_s18 = smov [#allocation5]   ;;  %s1209_s22 = scalar_lea.hbm %s1436_s1, 8192 }
   0x4   :  { %s30_s19 = sshll.u32 %s1327_s18, 4  ;;  %p1210_p0 = scmp.ne.s32.totalorder %s1436_s1, %s1209_s22  ;;  %s31_s19 = int_to_ptr.vmem [resolvable:$true] %s30_s19 }
   0x5   :  { %p1213_p1 = scmp.lt.u32.totalorder %s1209_s22, %s1436_s1 }
   0x7   :  { %p1215_p2 = pnand %p1213_p1, %p1210_p0 }
   0x9   :  { %1218 = shalt.err (!%p1215_p2)
}
   0xa   :  { %s1219_s27 = scalar_lea.vmem %s31_s19, 8192  ;;  %p1224_p4 = scmp.lt.s32.totalorder %s31_s19, %s31_s19 }
   0xb   :  { %p1220_p3 = scmp.ne.s32.totalorder %s31_s19, %s1219_s27  ;;  %p1225_p5 = scmp.lt.s32.totalorder %s1219_s27, %s1219_s27 }
   0xd   :  { %p1226_p6 = por %p1225_p5, %p1224_p4 }
   0xf   :  { %p1227_p7 = pnand %p1226_p6, %p1220_p3 }
  0x11   :  { %1230 = shalt.err (!%p1227_p7)
}
  0x12   :  { %s1328_s28 = smov 64   ;;  %s1329_s29 = smov 4  }
  0x13   :  { %36 = dma.hbm_to_vmem [thread:$0]  %s1436_s1, 8192, %s31_s19, [#allocation6], %s1328_s28, %s1328_s28, %s1329_s29  }
  0x14   :  { %s1330_s7 = smov [#allocation2]   ;;  %s1331_s9 = smov [#allocation7]  }
  0x15   :  { %s21_s8 = sshll.u32 %s1330_s7, 4  ;;  %s44_s10 = sshll.u32 %s1331_s9, 4  ;;  %s22_s8 = int_to_ptr.vmem [resolvable:$true] %s21_s8  ;;  %s45_s10 = int_to_ptr.vmem [resolvable:$true] %s44_s10 }
  0x16   :  { %s1231_s13 = scalar_lea.hbm %s1435_s0, 512 }
  0x17   :  { %p1232_p8 = scmp.ne.s32.totalorder %s1435_s0, %s1231_s13  ;;  %p1235_p9 = scmp.lt.u32.totalorder %s1231_s13, %s1435_s0 }
  0x19   :  { %p1237_p10 = pnand %p1235_p9, %p1232_p8 }
  0x1b   :  { %1240 = shalt.err (!%p1237_p10)
}
  0x1c   :  { %s1241_s1 = scalar_lea.vmem %s22_s8, 512  ;;  %p1246_p12 = scmp.lt.s32.totalorder %s22_s8, %s22_s8 }
  0x1d   :  { %p1242_p11 = scmp.ne.s32.totalorder %s22_s8, %s1241_s1  ;;  %p1247_p13 = scmp.lt.s32.totalorder %s1241_s1, %s1241_s1 }
  0x1f   :  { %p1248_p0 = por %p1247_p13, %p1246_p12 }
  0x21   :  { %p1249_p1 = pnand %p1248_p0, %p1242_p11 }
  0x23   :  { %1252 = shalt.err (!%p1249_p1)
}
  0x24   :  { %24 = dma.hbm_to_vmem [thread:$0]  %s1435_s0, 512, %s22_s8, [#allocation3]  }
  0x25   :  { %s1253_s22 = scalar_lea.hbm %s1438_s3, 1024 }
  0x26   :  { %p1254_p2 = scmp.ne.s32.totalorder %s1438_s3, %s1253_s22  ;;  %p1257_p3 = scmp.lt.u32.totalorder %s1253_s22, %s1438_s3 }
  0x28   :  { %p1259_p4 = pnand %p1257_p3, %p1254_p2 }
  0x2a   :  { %1262 = shalt.err (!%p1259_p4)
}
  0x2b   :  { %s1263_s27 = scalar_lea.vmem %s45_s10, 1024  ;;  %p1268_p6 = scmp.lt.s32.totalorder %s45_s10, %s45_s10 }
  0x2c   :  { %p1264_p5 = scmp.ne.s32.totalorder %s45_s10, %s1263_s27  ;;  %p1269_p7 = scmp.lt.s32.totalorder %s1263_s27, %s1263_s27 }
  0x2e   :  { %p1270_p8 = por %p1269_p7, %p1268_p6 }
  0x30   :  { %p1271_p9 = pnand %p1270_p8, %p1264_p5 }
  0x32   :  { %1274 = shalt.err (!%p1271_p9)
}
  0x33   :  { %50 = dma.hbm_to_vmem [thread:$0]  %s1438_s3, 1024, %s45_s10, [#allocation6], %s1328_s28, %s1328_s28, %s1329_s29  }
  0x34   :  { %1319 = dma.done.wait [#allocation3], 512  }
  0x35   :  { %1320 = vsyncadd [#allocation3], 4294966784 }
  0x36   :  { %1321 = dma.done.wait [#allocation6], 9216  }
  0x37   :  { %1322 = vsyncadd [#allocation6], 4294958080  ;;  %v1129_v0 = vld [vmem:[#allocation5 + $0x40] sm:$0xff]   ;;  %v1133_v4 = vld [vmem:[#allocation5 + $0x48] sm:$0xff]   ;;  %vm1333_vm0 = vmmov 0   ;;  %s1334_s29 = smov [#allocation8]  }
  0x38   :  { %v1130_v1 = vld [vmem:[#allocation5 + $0xc0] sm:$0xff]   ;;  %1003 = vmatprep.subr.bf16.mxu0 %v1129_v0  ;;  %v1134_v5 = vld [vmem:[#allocation5 + $0xc8] sm:$0xff]   ;;  %v1137_v8 = vld [vmem:[#allocation5 + $0x50] sm:$0xff]   ;;  %s898_s6 = sshll.u32 %s1334_s29, 4  ;;  %s899_s6 = int_to_ptr.vmem [resolvable:$true] %s898_s6 }
  0x39   :  { %v1131_v2 = vld [vmem:[#allocation5] sm:$0xff]   ;;  %1025 = vmatprep.subr.bf16.mxu1 %v1130_v1  ;;  %v1135_v6 = vld [vmem:[#allocation5 + $0x8] sm:$0xff]   ;;  %v1138_v9 = vld [vmem:[#allocation5 + $0xd0] sm:$0xff]   ;;  %s1275_s7 = scalar_lea.vmem %s899_s6, 128  ;;  %p1280_p11 = scmp.lt.s32.totalorder %s899_s6, %s899_s6 }
  0x3a   :  { %v1132_v3 = vld [vmem:[#allocation5 + $0x80] sm:$0xff]   ;;  %1004 = vmatpush3.bf16.msra.mxu0 %v1131_v2  ;;  %v1136_v7 = vld [vmem:[#allocation5 + $0x88] sm:$0xff]   ;;  %v1139_v10 = vld [vmem:[#allocation5 + $0x10] sm:$0xff]   ;;  %p1276_p10 = scmp.ne.s32.totalorder %s899_s6, %s1275_s7  ;;  %p1281_p12 = scmp.lt.s32.totalorder %s1275_s7, %s1275_s7 }
  0x3b   :  { %1026 = vmatpush3.bf16.msra.mxu1 %v1132_v3  ;;  %1005 = vmatprep.subr.bf16.mxu0 %v1133_v4  ;;  %v1140_v11 = vld [vmem:[#allocation5 + $0x90] sm:$0xff]   ;;  %v1141_v12 = vld [vmem:[#allocation5 + $0x58] sm:$0xff]   ;;  %v1145_v16 = vld [vmem:[#allocation5 + $0x60] sm:$0xff]  }
  0x3c   :  { %1027 = vmatprep.subr.bf16.mxu1 %v1134_v5  ;;  %v1142_v13 = vld [vmem:[#allocation5 + $0xd8] sm:$0xff]   ;;  %v1146_v17 = vld [vmem:[#allocation5 + $0xe0] sm:$0xff]   ;;  %v1149_v20 = vld [vmem:[#allocation5 + $0x68] sm:$0xff]   ;;  %p1282_p13 = por %p1281_p12, %p1280_p11 }
  0x3d   :  { %v1143_v14 = vld [vmem:[#allocation5 + $0x18] sm:$0xff]   ;;  %v1147_v18 = vld [vmem:[#allocation5 + $0x20] sm:$0xff]   ;;  %v1150_v21 = vld [vmem:[#allocation5 + $0xe8] sm:$0xff]  }
  0x3e   :  { %1006 = vmatpush3.bf16.msra.mxu0 %v1135_v6  ;;  %v1144_v15 = vld [vmem:[#allocation5 + $0x98] sm:$0xff]   ;;  %v1148_v19 = vld [vmem:[#allocation5 + $0xa0] sm:$0xff]   ;;  %v1151_v22 = vld [vmem:[#allocation5 + $0x28] sm:$0xff]   ;;  %p1283_p0 = pnand %p1282_p13, %p1276_p10 }
  0x3f   :  { %1028 = vmatpush3.bf16.msra.mxu1 %v1136_v7  ;;  %1007 = vmatprep.subr.bf16.mxu0 %v1137_v8  ;;  %v1152_v23 = vld [vmem:[#allocation5 + $0xa8] sm:$0xff]   ;;  %v1153_v24 = vld [vmem:[#allocation5 + $0x70] sm:$0xff]   ;;  %v1157_v28 = vld [vmem:[#allocation5 + $0x78] sm:$0xff]  }
  0x40   :  { %1029 = vmatprep.subr.bf16.mxu1 %v1138_v9  ;;  %v1154_v25 = vld [vmem:[#allocation5 + $0xf0] sm:$0xff]   ;;  %v1158_v29 = vld [vmem:[#allocation5 + $0xf8] sm:$0xff]   ;;  %v67_v32 = vld [vmem:[#allocation2] sm:$0xff] }
  0x41   :  { %v1155_v26 = vld [vmem:[#allocation5 + $0x30] sm:$0xff]   ;;  %v1159_v30 = vld [vmem:[#allocation5 + $0x38] sm:$0xff]   ;;  %v68_v33 = vld [vmem:[#allocation2 + $0x8] sm:$0xff]  ;;  %v922_v34 = vcombine.low %v67_v32, %v67_v32  ;;  %v923_v35 = vcombine.high %v67_v32, %v67_v32 }
  0x42   :  { %1008 = vmatpush3.bf16.msra.mxu0 %v1139_v10  ;;  %v1156_v27 = vld [vmem:[#allocation5 + $0xb0] sm:$0xff]   ;;  %v1160_v31 = vld [vmem:[#allocation5 + $0xb8] sm:$0xff]   ;;  %v924_v36 = vcombine.low %v68_v33, %v68_v33  ;;  %v925_v37 = vcombine.high %v68_v33, %v68_v33  ;;  %v1165_v38 = vld [vmem:[#allocation5 + $0x140] sm:$0xff]  }
  0x43   :  { %1030 = vmatpush3.bf16.msra.mxu1 %v1140_v11  ;;  %1009 = vmatprep.subr.bf16.mxu0 %v1141_v12  ;;  %v1166_v39 = vld [vmem:[#allocation5 + $0x1c0] sm:$0xff]   ;;  %v1169_v42 = vld [vmem:[#allocation5 + $0x148] sm:$0xff]   ;;  %v1173_v46 = vld [vmem:[#allocation5 + $0x150] sm:$0xff]  }
  0x44   :  { %1031 = vmatprep.subr.bf16.mxu1 %v1142_v13  ;;  %643 = vmatprep.mubr.bf16.mxu0 %v923_v35  ;;  %v1167_v40 = vld [vmem:[#allocation5 + $0x100] sm:$0xff]   ;;  %v1170_v43 = vld [vmem:[#allocation5 + $0x1c8] sm:$0xff]   ;;  %v1174_v47 = vld [vmem:[#allocation5 + $0x1d0] sm:$0xff]   ;;  %v1332_v13 = vmov 0.0  }
  0x45   :  { %683 = vmatprep.mubr.bf16.mxu1 %v925_v37  ;;  %v1168_v41 = vld [vmem:[#allocation5 + $0x180] sm:$0xff]   ;;  %v1171_v44 = vld [vmem:[#allocation5 + $0x108] sm:$0xff]   ;;  %v1175_v48 = vld [vmem:[#allocation5 + $0x110] sm:$0xff]  }
  0x46   :  { %1010 = vmatpush3.bf16.msra.mxu0 %v1143_v14  ;;  %v1172_v45 = vld [vmem:[#allocation5 + $0x188] sm:$0xff]   ;;  %v1176_v49 = vld [vmem:[#allocation5 + $0x190] sm:$0xff]   ;;  %v1177_v50 = vld [vmem:[#allocation5 + $0x158] sm:$0xff]  }
  0x47   :  { %1032 = vmatpush3.bf16.msra.mxu1 %v1144_v15  ;;  %1011 = vmatprep.subr.bf16.mxu0 %v1145_v16  ;;  %v1178_v51 = vld [vmem:[#allocation5 + $0x1d8] sm:$0xff]   ;;  %v1181_v54 = vld [vmem:[#allocation5 + $0x160] sm:$0xff]   ;;  %v1185_v58 = vld [vmem:[#allocation5 + $0x168] sm:$0xff]  }
  0x48   :  { %1033 = vmatprep.subr.bf16.mxu1 %v1146_v17  ;;  %v1179_v52 = vld [vmem:[#allocation5 + $0x118] sm:$0xff]   ;;  %v1182_v55 = vld [vmem:[#allocation5 + $0x1e0] sm:$0xff]   ;;  %v1186_v59 = vld [vmem:[#allocation5 + $0x1e8] sm:$0xff]  }
  0x49   :  { %v1180_v53 = vld [vmem:[#allocation5 + $0x198] sm:$0xff]   ;;  %v1183_v56 = vld [vmem:[#allocation5 + $0x120] sm:$0xff]   ;;  %v1187_v60 = vld [vmem:[#allocation5 + $0x128] sm:$0xff]  }
  0x4a   :  { %1012 = vmatpush3.bf16.msra.mxu0 %v1147_v18  ;;  %v1184_v57 = vld [vmem:[#allocation5 + $0x1a0] sm:$0xff]   ;;  %v1188_v61 = vld [vmem:[#allocation5 + $0x1a8] sm:$0xff]   ;;  %v1189_v62 = vld [vmem:[#allocation5 + $0x170] sm:$0xff]  }
  0x4b   :  { %1034 = vmatpush3.bf16.msra.mxu1 %v1148_v19  ;;  %1013 = vmatprep.subr.bf16.mxu0 %v1149_v20  ;;  %v1190_v63 = vld [vmem:[#allocation5 + $0x1f0] sm:$0xff]   ;;  %v1193_v2 = vld [vmem:[#allocation5 + $0x178] sm:$0xff]   ;;  %v1201_v12 = vld [vmem:[#allocation7] sm:$0xff]  }
  0x4c   :  { %1035 = vmatprep.subr.bf16.mxu1 %v1150_v21  ;;  %v1191_v0 = vld [vmem:[#allocation5 + $0x130] sm:$0xff]   ;;  %v1194_v3 = vld [vmem:[#allocation5 + $0x1f8] sm:$0xff]   ;;  %v1202_v14 = vld [vmem:[#allocation7 + $0x8] sm:$0xff]  }
  0x4d   :  { %v1192_v1 = vld [vmem:[#allocation5 + $0x1b0] sm:$0xff]   ;;  %v1195_v4 = vld [vmem:[#allocation5 + $0x138] sm:$0xff]   ;;  %v1205_v17 = vld [vmem:[#allocation7 + $0x20] sm:$0xff]  }
  0x4e   :  { %1014 = vmatpush3.bf16.msra.mxu0 %v1151_v22  ;;  %v1196_v5 = vld [vmem:[#allocation5 + $0x1b8] sm:$0xff]   ;;  %v69_v6 = vld [vmem:[#allocation2 + $0x10] sm:$0xff]  ;;  %v1206_v18 = vld [vmem:[#allocation7 + $0x28] sm:$0xff]  }
  0x4f   :  { %1036 = vmatpush3.bf16.msra.mxu1 %v1152_v23  ;;  %1015 = vmatprep.subr.bf16.mxu0 %v1153_v24  ;;  %v926_v7 = vcombine.low %v69_v6, %v69_v6  ;;  %v927_v8 = vcombine.high %v69_v6, %v69_v6  ;;  %v70_v9 = vld [vmem:[#allocation2 + $0x18] sm:$0xff]  ;;  %v1203_v15 = vld [vmem:[#allocation7 + $0x10] sm:$0xff]  }
  0x50   :  { %1037 = vmatprep.subr.bf16.mxu1 %v1154_v25  ;;  %v928_v10 = vcombine.low %v70_v9, %v70_v9  ;;  %v929_v11 = vcombine.high %v70_v9, %v70_v9  ;;  %v1204_v16 = vld [vmem:[#allocation7 + $0x18] sm:$0xff]   ;;  %v1207_v19 = vld [vmem:[#allocation7 + $0x30] sm:$0xff]  }
  0x51   :  { %v1208_v20 = vld [vmem:[#allocation7 + $0x38] sm:$0xff]  }
  0x52   :  { %1016 = vmatpush3.bf16.msra.mxu0 %v1155_v26 }
  0x53   :  { %1038 = vmatpush3.bf16.msra.mxu1 %v1156_v27  ;;  %1017 = vmatprep.subr.bf16.mxu0 %v1157_v28 }
  0x54   :  { %1039 = vmatprep.subr.bf16.mxu1 %v1158_v29 }
  0x56   :  { %1018 = vmatpush3.bf16.msra.mxu0 %v1159_v30 }
  0x57   :  { %1040 = vmatpush3.bf16.msra.mxu1 %v1160_v31  ;;  %1047 = vmatprep.subr.bf16.mxu0 %v1165_v38 }
  0x58   :  { %1069 = vmatprep.subr.bf16.mxu1 %v1166_v39 }
  0x59   :  { %644 = vmatmul.mubr.bf16.vlgmr.msra.gmra.mrb[0].mxu0 %v922_v34 }
  0x5a   :  { %684 = vmatmul.mubr.bf16.vlgmr.msra.gmra.mrb[0].mxu1 %v924_v36  ;;  %1048 = vmatpush3.bf16.msra.mxu0 %v1167_v40 }
  0x5b   :  { %1070 = vmatpush3.bf16.msra.mxu1 %v1168_v41  ;;  %1049 = vmatprep.subr.bf16.mxu0 %v1169_v42 }
  0x5c   :  { %1071 = vmatprep.subr.bf16.mxu1 %v1170_v43  ;;  %723 = vmatprep.mubr.bf16.mxu0 %v927_v8 }
  0x5d   :  { %763 = vmatprep.mubr.bf16.mxu1 %v929_v11 }
  0x5e   :  { %1050 = vmatpush3.bf16.msra.mxu0 %v1171_v44  ;;  %v994_v44 = vld [vmem:[%s1437_s2] ss:$0 sm:$0xff] }
  0x5f   :  { %1072 = vmatpush3.bf16.msra.mxu1 %v1172_v45  ;;  %1051 = vmatprep.subr.bf16.mxu0 %v1173_v46 }
  0x60   :  { %1073 = vmatprep.subr.bf16.mxu1 %v1174_v47 }
  0x62   :  { %1052 = vmatpush3.bf16.msra.mxu0 %v1175_v48 }
  0x63   :  { %1074 = vmatpush3.bf16.msra.mxu1 %v1176_v49  ;;  %1053 = vmatprep.subr.bf16.mxu0 %v1177_v50 }
  0x64   :  { %1075 = vmatprep.subr.bf16.mxu1 %v1178_v51 }
  0x66   :  { %1054 = vmatpush3.bf16.msra.mxu0 %v1179_v52 }
  0x67   :  { %1076 = vmatpush3.bf16.msra.mxu1 %v1180_v53  ;;  %1055 = vmatprep.subr.bf16.mxu0 %v1181_v54 }
  0x68   :  { %1077 = vmatprep.subr.bf16.mxu1 %v1182_v55 }
  0x6a   :  { %1056 = vmatpush3.bf16.msra.mxu0 %v1183_v56 }
  0x6b   :  { %1078 = vmatpush3.bf16.msra.mxu1 %v1184_v57  ;;  %1057 = vmatprep.subr.bf16.mxu0 %v1185_v58 }
  0x6c   :  { %1079 = vmatprep.subr.bf16.mxu1 %v1186_v59 }
  0x6e   :  { %1058 = vmatpush3.bf16.msra.mxu0 %v1187_v60 }
  0x6f   :  { %1080 = vmatpush3.bf16.msra.mxu1 %v1188_v61  ;;  %1059 = vmatprep.subr.bf16.mxu0 %v1189_v62 }
  0x70   :  { %1081 = vmatprep.subr.bf16.mxu1 %v1190_v63 }
  0x72   :  { %1060 = vmatpush3.bf16.msra.mxu0 %v1191_v0 }
  0x73   :  { %1082 = vmatpush3.bf16.msra.mxu1 %v1192_v1  ;;  %1061 = vmatprep.subr.bf16.mxu0 %v1193_v2 }
  0x74   :  { %1083 = vmatprep.subr.bf16.mxu1 %v1194_v3 }
  0x76   :  { %1062 = vmatpush3.bf16.msra.mxu0 %v1195_v4 }
  0x77   :  { %1084 = vmatpush3.bf16.msra.mxu1 %v1196_v5  ;;  %1100 = vmatprep.subr.bf16.mxu0 %v1332_v13 }
  0x79   :  { %724 = vmatmul.mubr.bf16.vlgmr.msra.gmra.mrb[4].mxu0 %v926_v7 }
  0x7a   :  { %764 = vmatmul.mubr.bf16.vlgmr.msra.gmra.mrb[4].mxu1 %v928_v10  ;;  %1101 = vmatpush3.bf16.msra.mxu0 %v1201_v12 }
  0x7b   :  { %1102 = vmatprep.subr.bf16.mxu0 %v1332_v13  ;;  %1116 = vmatprep.mubr.msk.bf16.mxu0 %vm1333_vm0, %v1332_v13 }
  0x7e   :  { %1103 = vmatpush3.bf16.msra.mxu0 %v1202_v14 }
  0x7f   :  { %1104 = vmatprep.subr.bf16.mxu0 %v1332_v13 }
  0x82   :  { %1105 = vmatpush3.bf16.msra.mxu0 %v1203_v15 }
  0x83   :  { %1106 = vmatprep.subr.bf16.mxu0 %v1332_v13 }
  0x86   :  { %1107 = vmatpush3.bf16.msra.mxu0 %v1204_v16 }
  0x87   :  { %1108 = vmatprep.subr.bf16.mxu0 %v1332_v13 }
  0x8a   :  { %1109 = vmatpush3.bf16.msra.mxu0 %v1205_v17 }
  0x8b   :  { %1110 = vmatprep.subr.bf16.mxu0 %v1332_v13 }
  0x8e   :  { %1111 = vmatpush3.bf16.msra.mxu0 %v1206_v18 }
  0x8f   :  { %1112 = vmatprep.subr.bf16.mxu0 %v1332_v13 }
  0x92   :  { %1113 = vmatpush3.bf16.msra.mxu0 %v1207_v19 }
  0x93   :  { %1114 = vmatprep.subr.bf16.mxu0 %v1332_v13 }
  0x96   :  { %1115 = vmatpush3.bf16.msra.mxu0 %v1208_v20 }
 0x12c   :  { %v1019_v21 = vpop.f32.mrb[0].mxu0 }
 0x12d   :  { %v1041_v22 = vpop.f32.mrb[0].mxu1  ;;  %v1020_v23 = vpop.f32.mrb[1].mxu0 }
 0x12e   :  { %v1042_v24 = vpop.f32.mrb[1].mxu1  ;;  %v1021_v25 = vadd.f32 %v1020_v23, %v1019_v21  ;;  %v1022_v27 = vpop.f32.mrb[2].mxu0 }
 0x12f   :  { %v1043_v26 = vadd.f32 %v1042_v24, %v1041_v22  ;;  %v1044_v28 = vpop.f32.mrb[2].mxu1  ;;  %v1023_v29 = vpop.f32.mrb[3].mxu0 }
 0x130   :  { %v1045_v30 = vpop.f32.mrb[3].mxu1 }
 0x131   :  { %v686_v31 = vadd.f32 %v1043_v26, %v1021_v25 }
 0x14c   :  { %v1063_v32 = vpop.f32.mrb[4].mxu0 }
 0x14d   :  { %v1085_v33 = vpop.f32.mrb[4].mxu1  ;;  %v1064_v34 = vpop.f32.mrb[5].mxu0 }
 0x14e   :  { %v1086_v35 = vpop.f32.mrb[5].mxu1  ;;  %v1065_v36 = vadd.f32 %v1064_v34, %v1063_v32  ;;  %v1066_v38 = vpop.f32.mrb[6].mxu0 }
 0x14f   :  { %v1087_v37 = vadd.f32 %v1086_v35, %v1085_v33  ;;  %v1088_v39 = vpop.f32.mrb[6].mxu1  ;;  %v1067_v40 = vpop.f32.mrb[7].mxu0 }
 0x150   :  { %v1089_v41 = vpop.f32.mrb[7].mxu1  ;;  %v726_v42 = vadd.f32 %v1065_v36, %v686_v31 }
 0x152   :  { %v766_v43 = vadd.f32 %v1087_v37, %v726_v42 }
 0x154   :  { %v784_v45 = vadd.f32 %v994_v44, %v766_v43 }
 0x156   :  { %v786_v46 = vpack.c.bf16 %v784_v45, %v784_v45  ;;  %785 = vst [vmem:[#allocation8] sm:$0xff] %v784_v45 }
 0x158   :  { %1117 = vmatmul.mubr.bf16.vlgmr.msra.gmra.mrb[8].mxu0 %v786_v46 }
 0x159   :  { %1286 = shalt.err (!%p1283_p0)
}
 0x15a   :  { %s1287_s10 = scalar_lea.hbm %s1439_s4, 128 }
 0x15b   :  { %p1288_p1 = scmp.ne.s32.totalorder %s1439_s4, %s1287_s10  ;;  %p1291_p2 = scmp.lt.u32.totalorder %s1287_s10, %s1439_s4 }
 0x15d   :  { %p1293_p3 = pnand %p1291_p2, %p1288_p1 }
 0x15f   :  { %1296 = shalt.err (!%p1293_p3)
}
 0x160   :  { %901 = dma.vmem_to_hbm [thread:$0]  %s899_s6, 128, %s1439_s4, [#allocation4]  }
 0x161   :  { %s1335_s16 = smov [#allocation9]  }
 0x162   :  { %s908_s17 = sshll.u32 %s1335_s16, 4  ;;  %s909_s17 = int_to_ptr.vmem [resolvable:$true] %s908_s17 }
 0x163   :  { %s1297_s1 = scalar_lea.vmem %s909_s17, 128  ;;  %p1302_p5 = scmp.lt.s32.totalorder %s909_s17, %s909_s17 }
 0x164   :  { %p1298_p4 = scmp.ne.s32.totalorder %s909_s17, %s1297_s1  ;;  %p1303_p6 = scmp.lt.s32.totalorder %s1297_s1, %s1297_s1 }
 0x166   :  { %p1304_p7 = por %p1303_p6, %p1302_p5 }
 0x168   :  { %p1305_p8 = pnand %p1304_p7, %p1298_p4 }
 0x22b   :  { %v885_v47 = vpop.f32.mrb[8].mxu0 }
 0x22c   :  { %891 = vst [vmem:[#allocation9] sm:$0xff] %v885_v47  ;;  %v1118_v48 = vpop.f32.mrb[9].mxu0 }
 0x22d   :  { %v888_v49 = vpop.f32.mrb[10].mxu0 }
 0x22e   :  { %1308 = shalt.err (!%p1305_p8)
}
 0x22f   :  { %s1309_s20 = scalar_lea.hbm %s1440_s5, 128 }
 0x230   :  { %p1310_p9 = scmp.ne.s32.totalorder %s1440_s5, %s1309_s20  ;;  %p1313_p10 = scmp.lt.u32.totalorder %s1309_s20, %s1440_s5 }
 0x232   :  { %p1315_p11 = pnand %p1313_p10, %p1310_p9 }
 0x234   :  { %1318 = shalt.err (!%p1315_p11)
}
 0x235   :  { %911 = dma.vmem_to_hbm [thread:$0]  %s909_s17, 128, %s1440_s5, [#allocation10]   ;;  %v1119_v50 = vpop.f32.mrb[11].mxu0 }
 0x236   :  { %1323 = dma.done.wait [#allocation4], 128  }
 0x237   :  { %1324 = vsyncadd [#allocation4], 4294967168 }
 0x238   :  { %1325 = dma.done.wait [#allocation10], 128  }
 0x239   :  { %1326 = vsyncadd [#allocation10], 4294967168 }
 0x23a   :  { %918 = vsyncpa [#allocation3], 1 }
 0x23b   :  { %919 = vsyncpa [#allocation6], 1 }
 0x23c   :  { %920 = vsyncpa [#allocation4], 1 }
 0x23d   :  { %921 = vsyncpa [#allocation10], 1 }

</bundles_post_ra>
